<compile_context>
chip_gen: v7x
topology: tpu7x:2x2x1
jax: 0.10.0
libtpu: 0.0.40
codegen_flags: <defaults>
</compile_context>

<pallas_src>
import math

import jax
import jax.numpy as jnp
from jax.experimental import pallas as pl
from jax.experimental.pallas import tpu as pltpu


def _round_up(x, m):
    return ((x + m - 1) // m) * m


# --------------------------------------------------------------------------
# Fused kernel:  out = ReLU( M @ (X @ W^T + b) )
# --------------------------------------------------------------------------
def homconv_kernel(m_ref, x_ref, w_ref, b_ref, o_ref):
    k = pl.program_id(1)

    @pl.when(k == 0)
    def _():
        o_ref[...] = jnp.zeros_like(o_ref)

    # H k-block recomputed in-kernel: (tk, C_pad); bf16 MXU operands, f32 accumulate,
    # f32 bias epilogue.  Adding the bias per k-block is exact: sum_k M[:,k] @ 1*b
    # == rowsum(M) * b == M @ (1 b), and padded M columns are zero.
    h = jnp.dot(x_ref[...], w_ref[...], preferred_element_type=jnp.float32)
    h = (h + b_ref[...]).astype(jnp.bfloat16)

    # Accumulate straight into the resident f32 output block (constant block
    # index across the reduction axis -> stays in VMEM, no scratch needed).
    o_ref[...] += jnp.dot(m_ref[...], h, preferred_element_type=jnp.float32)

    @pl.when(k == pl.num_programs(1) - 1)
    def _():
        o_ref[...] = jnp.maximum(o_ref[...], 0.0)   # ReLU epilogue (f32)
    # TODO(synk): training-mode Dropout (stochastic mask via pltpu.prng_*) omitted;
    #             eval-mode identity used.


# --------------------------------------------------------------------------
# Wrapper
# --------------------------------------------------------------------------
def homconv_pallas(x, w_t, b, m, *, tile_m=512, tile_k=256):
    """x: [N, C_in] f32, w_t: [C_in, C_out] (W transposed), b: [1, C_out],
    m: [N, N] fused propagation matrix (ideally already bf16)."""
    n, c_in = x.shape
    c_out = w_t.shape[1]
    c_out_p = _round_up(c_out, 128)            # lane-dense channel axis

    # ---- tile / padding selection (no full-extent fallback -> no VMEM cliff) ----
    n128 = _round_up(n, 128)
    tm = min(tile_m, n128)
    tk = min(tile_k, n128)
    if n128 // tm < 2 and tm > 128:
        # keep >= 2 row tiles so both v7x TensorCores get work on the parallel axis
        tm = _round_up(max(n128 // 2, 128), 128)
    n_pad = _round_up(n128, math.lcm(tm, tk))

    # ---- operand prep (zero padding is exact; padded rows/cols sliced off) -----
    m_bf = m if m.dtype == jnp.bfloat16 else m.astype(jnp.bfloat16)
    if n_pad != n:
        m_bf = jnp.zeros((n_pad, n_pad), jnp.bfloat16).at[:n, :n].set(m_bf)
    x_bf = jnp.zeros((n_pad, c_in), jnp.bfloat16).at[:n, :].set(
        x.astype(jnp.bfloat16))
    w_p = jnp.zeros((c_in, c_out_p), jnp.bfloat16).at[:, :c_out].set(
        w_t.astype(jnp.bfloat16))
    b_p = jnp.zeros((1, c_out_p), jnp.float32).at[:, :c_out].set(
        b.astype(jnp.float32))

    grid = (n_pad // tm, n_pad // tk)

    # VMEM budget from actual (double-buffered) block sizes + 2x headroom,
    # capped well below v7x's 64 MiB physical VMEM.
    vmem_needed = (2 * tm * tk * 2            # M tiles (bf16, streamed)
                   + 2 * tk * c_in * 2        # X k-blocks (bf16)
                   + 2 * c_in * c_out_p * 2   # W (resident)
                   + 2 * c_out_p * 4          # bias (resident)
                   + 2 * tm * c_out_p * 4)    # f32 output/accumulator block
    vmem_limit = min(max(2 * vmem_needed, 4 << 20), 32 << 20)

    out_p = pl.pallas_call(
        homconv_kernel,
        out_shape=jax.ShapeDtypeStruct((n_pad, c_out_p), jnp.float32),
        grid=grid,
        in_specs=[
            pl.BlockSpec((tm, tk), lambda i, k: (i, k)),          # M tile (dominant stream)
            pl.BlockSpec((tk, c_in), lambda i, k: (k, 0)),        # X k-block
            pl.BlockSpec((c_in, c_out_p), lambda i, k: (0, 0)),   # W^T, VMEM-resident
            pl.BlockSpec((1, c_out_p), lambda i, k: (0, 0)),      # bias, VMEM-resident
        ],
        out_specs=pl.BlockSpec((tm, c_out_p), lambda i, k: (i, 0)),
        compiler_params=pltpu.CompilerParams(
            dimension_semantics=("parallel", "arbitrary"),
            vmem_limit_bytes=vmem_limit),
    )(m_bf, x_bf, w_p, b_p)

    return out_p[:n, :c_out]
    # TODO(synk): on v7x the streamed M could be quantized to fp8 (values in [0,1])
    #             to halve the dominant HBM stream; for very large N a gather-based
    #             sparse aggregation (scalar-prefetched neighbor table) is preferable
    #             to the dense N x N operator.


# --------------------------------------------------------------------------
# Graph construction (deterministic) + reference
# --------------------------------------------------------------------------
def build_graph_matrices(n):
    """Deterministic simple graph: ring + skip-4 chords. Returns (L_gcn, P_mean)."""
    idx = jnp.arange(n)
    a = jnp.zeros((n, n), jnp.float32)
    a = a.at[idx, (idx + 1) % n].set(1.0)
    a = a.at[(idx + 1) % n, idx].set(1.0)
    a = a.at[idx, (idx + 4) % n].set(1.0)
    a = a.at[(idx + 4) % n, idx].set(1.0)
    a = a * (1.0 - jnp.eye(n, dtype=jnp.float32))     # no self loops

    # GCN smoothing operator: D̂^{-1/2} (A + I) D̂^{-1/2}
    a_hat = a + jnp.eye(n, dtype=jnp.float32)
    d_inv_sqrt = 1.0 / jnp.sqrt(jnp.sum(a_hat, axis=1))
    l_gcn = d_inv_sqrt[:, None] * a_hat * d_inv_sqrt[None, :]

    # mean-neighbor aggregation operator: D^{-1} A
    deg = jnp.maximum(jnp.sum(a, axis=1), 1.0)
    p_mean = a / deg[:, None]
    return l_gcn, p_mean


def reference_forward(x, w_t, b, l_gcn, p_mean):
    h = x @ w_t + b
    return jnp.maximum((l_gcn @ h + p_mean @ h) / 2.0, 0.0)


# --------------------------------------------------------------------------
if __name__ == "__main__":
    N = 256         # number of vertices
    C_IN = 32       # in_channels
    C_OUT = 32      # out_channels (padded to 128 lanes inside the wrapper)

    key = jax.random.PRNGKey(0)
    k_x, k_w, k_b = jax.random.split(key, 3)

    x = jax.random.normal(k_x, (N, C_IN), dtype=jnp.float32)

    # nn.Linear(C_IN, C_OUT) init: U(-1/sqrt(C_IN), 1/sqrt(C_IN)); W stored transposed.
    bound = 1.0 / (C_IN ** 0.5)
    w_t = jax.random.uniform(k_w, (C_IN, C_OUT), jnp.float32, -bound, bound)
    b = jax.random.uniform(k_b, (1, C_OUT), jnp.float32, -bound, bound)

    l_gcn, p_mean = build_graph_matrices(N)
    # Fused (spectral + spatial)/2 propagation matrix, built ONCE in bf16 so the
    # per-forward path does not re-cast the N x N matrix.
    m = ((l_gcn + p_mean) / 2.0).astype(jnp.bfloat16)

    out = homconv_pallas(x, w_t, b, m)
    out = jax.block_until_ready(out)

    ref = reference_forward(x, w_t, b, l_gcn, p_mean)
    assert out.shape == (N, C_OUT)
    err = jnp.max(jnp.abs(out - ref))
    scale = jnp.maximum(1.0, jnp.max(jnp.abs(ref)))
    # bf16 MXU operands (X, W, M) -> loosened tolerance vs. pure-f32 reference
    assert err < 2e-2 * scale, f"mismatch vs reference: {err}"

    print("KERNEL_OK")
</pallas_src>

<mosaic_0001>
module attributes {stable_mosaic.version = 11 : i64} {
  func.func @homconv_kernel(%arg0: i32, %arg1: i32, %arg2: memref<128x256xbf16, #tpu.memory_space<vmem>>, %arg3: memref<256x32xbf16, #tpu.memory_space<vmem>>, %arg4: memref<32x128xbf16, #tpu.memory_space<vmem>>, %arg5: memref<1x128xf32, #tpu.memory_space<vmem>>, %arg6: memref<128x128xf32, #tpu.memory_space<vmem>>) attributes {dimension_semantics = [#tpu.dimension_semantics<parallel>, #tpu.dimension_semantics<arbitrary>], iteration_bounds = array<i64: 2, 1>, scalar_prefetch = 0 : i64, scratch_operands = 0 : i64, tpu.core_type = #tpu.core_type<tc>, window_params = [{transform_indices = @transform_0, window_bounds = array<i64: 128, 256>}, {transform_indices = @transform_1, window_bounds = array<i64: 256, 32>}, {pipeline_mode = #tpu.pipeline_mode<synchronous>, transform_indices = @transform_2, window_bounds = array<i64: 32, 128>}, {pipeline_mode = #tpu.pipeline_mode<synchronous>, transform_indices = @transform_3, window_bounds = array<i64: 1, 128>}, {transform_indices = @transform_4, window_bounds = array<i64: 128, 128>}]} {
    %c0_i32 = arith.constant 0 : i32
    %0 = arith.cmpi eq, %arg1, %c0_i32 : i32
    %1 = arith.extui %0 : i1 to i32
    %c0_i32_0 = arith.constant 0 : i32
    %2 = arith.cmpi ne, %1, %c0_i32_0 : i32
    scf.if %2 {
      %cst_15 = arith.constant 0.000000e+00 : f32
      %18 = vector.broadcast %cst_15 : f32 to vector<128x128xf32>
      %c0_16 = arith.constant 0 : index
      %c0_17 = arith.constant 0 : index
      %19 = vector.load %arg6[%c0_16, %c0_17] : memref<128x128xf32, #tpu.memory_space<vmem>>, vector<128x128xf32>
      tpu.vector_store %arg6[%c0_16, %c0_17], %18 {strides = array<i32>} : memref<128x128xf32, #tpu.memory_space<vmem>>, vector<128x128xf32>,
    } else {
    }
    %c0 = arith.constant 0 : index
    %c0_1 = arith.constant 0 : index
    %3 = vector.load %arg3[%c0, %c0_1] : memref<256x32xbf16, #tpu.memory_space<vmem>>, vector<256x32xbf16>
    %c0_2 = arith.constant 0 : index
    %c0_3 = arith.constant 0 : index
    %4 = vector.load %arg4[%c0_2, %c0_3] : memref<32x128xbf16, #tpu.memory_space<vmem>>, vector<32x128xbf16>
    %cst = arith.constant dense<0.000000e+00> : vector<256x128xf32>
    %5 = tpu.matmul %3, %4, %cst {dimension_numbers = #tpu.dot_dimension_numbers<[1], [0], [0], [1], [0, 0, 1, 1], [], []>} : vector<256x32xbf16>, vector<32x128xbf16>, vector<256x128xf32> -> vector<256x128xf32>
    %c0_4 = arith.constant 0 : index
    %c0_5 = arith.constant 0 : index
    %6 = vector.load %arg5[%c0_4, %c0_5] : memref<1x128xf32, #tpu.memory_space<vmem>>, vector<1x128xf32>
    %7 = vector.broadcast %6 : vector<1x128xf32> to vector<256x128xf32>
    %8 = arith.addf %5, %7 : vector<256x128xf32>
    %9 = arith.truncf %8 : vector<256x128xf32> to vector<256x128xbf16>
    %c0_6 = arith.constant 0 : index
    %c0_7 = arith.constant 0 : index
    %10 = vector.load %arg6[%c0_6, %c0_7] : memref<128x128xf32, #tpu.memory_space<vmem>>, vector<128x128xf32>
    %c0_8 = arith.constant 0 : index
    %c0_9 = arith.constant 0 : index
    %11 = vector.load %arg2[%c0_8, %c0_9] : memref<128x256xbf16, #tpu.memory_space<vmem>>, vector<128x256xbf16>
    %cst_10 = arith.constant dense<0.000000e+00> : vector<128x128xf32>
    %12 = tpu.matmul %11, %9, %cst_10 {dimension_numbers = #tpu.dot_dimension_numbers<[1], [0], [0], [1], [0, 0, 1, 1], [], []>} : vector<128x256xbf16>, vector<256x128xbf16>, vector<128x128xf32> -> vector<128x128xf32>
    %13 = arith.addf %10, %12 : vector<128x128xf32>
    %c0_11 = arith.constant 0 : index
    %c0_12 = arith.constant 0 : index
    %14 = vector.load %arg6[%c0_11, %c0_12] : memref<128x128xf32, #tpu.memory_space<vmem>>, vector<128x128xf32>
    tpu.vector_store %arg6[%c0_11, %c0_12], %13 {strides = array<i32>} : memref<128x128xf32, #tpu.memory_space<vmem>>, vector<128x128xf32>,
    %c0_i32_13 = arith.constant 0 : i32
    %15 = arith.cmpi eq, %arg1, %c0_i32_13 : i32
    %16 = arith.extui %15 : i1 to i32
    %c0_i32_14 = arith.constant 0 : i32
    %17 = arith.cmpi ne, %16, %c0_i32_14 : i32
    scf.if %17 {
      %c0_15 = arith.constant 0 : index
      %c0_16 = arith.constant 0 : index
      %18 = vector.load %arg6[%c0_15, %c0_16] : memref<128x128xf32, #tpu.memory_space<vmem>>, vector<128x128xf32>
      %cst_17 = arith.constant 0.000000e+00 : f32
      %19 = vector.broadcast %cst_17 : f32 to vector<128x128xf32>
      %20 = arith.maximumf %18, %19 : vector<128x128xf32>
      %c0_18 = arith.constant 0 : index
      %c0_19 = arith.constant 0 : index
      %21 = vector.load %arg6[%c0_18, %c0_19] : memref<128x128xf32, #tpu.memory_space<vmem>>, vector<128x128xf32>
      tpu.vector_store %arg6[%c0_18, %c0_19], %20 {strides = array<i32>} : memref<128x128xf32, #tpu.memory_space<vmem>>, vector<128x128xf32>,
    } else {
    }
    return
  }
  func.func @transform_0(%arg0: i32, %arg1: i32) -> (i32, i32) {
    %c0_i32 = arith.constant 0 : i32
    return %arg0, %arg1 : i32, i32
  }
  func.func @transform_1(%arg0: i32, %arg1: i32) -> (i32, i32) {
    %c0_i32 = arith.constant 0 : i32
    %c0_i32_0 = arith.constant 0 : i32
    return %arg1, %c0_i32 : i32, i32
  }
  func.func @transform_2(%arg0: i32, %arg1: i32) -> (i32, i32) {
    %c0_i32 = arith.constant 0 : i32
    %c0_i32_0 = arith.constant 0 : i32
    %c0_i32_1 = arith.constant 0 : i32
    return %c0_i32, %c0_i32_0 : i32, i32
  }
  func.func @transform_3(%arg0: i32, %arg1: i32) -> (i32, i32) {
    %c0_i32 = arith.constant 0 : i32
    %c0_i32_0 = arith.constant 0 : i32
    %c0_i32_1 = arith.constant 0 : i32
    return %c0_i32, %c0_i32_0 : i32, i32
  }
  func.func @transform_4(%arg0: i32, %arg1: i32) -> (i32, i32) {
    %c0_i32 = arith.constant 0 : i32
    %c0_i32_0 = arith.constant 0 : i32
    return %arg0, %c0_i32 : i32, i32
  }
}

</mosaic_0001>

<bundles_post_ra>
// kernel: tpu_custom_call.1
= control target key start
LH: loop header
LB: loop body
LE: loop exit
PB: predicated region body
PF: predicated region fallthrough
CT: control target
= control target key end

     0   :  { %9 = vsyncpa [#allocation3], 0  ;;  %s1843_s0 = inlined_call_operand.hbm [shape: bf16[256,256], index: 0, kind: input, shape index: {}]   ;;  %s1844_s1 = inlined_call_operand.vmem [shape: bf16[256,32], index: 1, kind: input, shape index: {}]   ;;  %s1845_s2 = inlined_call_operand.vmem [shape: bf16[32,128], index: 2, kind: input, shape index: {}]   ;;  %s1846_s3 = inlined_call_operand.vmem [shape: f32[1,128], index: 3, kind: input, shape index: {}]   ;;  %s1847_s4 = inlined_call_operand.hbm [shape: f32[256,128], index: 4, kind: output, shape index: {}]  }
   0x1   :  { %11 = vsyncpa [#allocation3 + $0x1], 0 }
   0x2   :  { %12 = vsyncpa [#allocation4], 0 }
   0x3   :  { %14 = vsyncpa [#allocation4 + $0x1], 0  ;;  %s1504_s15 = smov 0   ;;  %s1506_s16 = smov 0  }
   0x4   :  { %s1508_s17 = smov 0   ;;  %s1510_s18 = smov 0  }
   0x5   :  { %s1512_s19 = smov 0   ;;  %s1514_s20 = smov 0  }
   0x6 LB: > { %s1045_s21 = sadd.s32 4294967295, %s1471_s20   ;;  %s1046_s22 = sadd.s32 4294967294, %s1471_s20   ;;  %s1471_s20 = sphi %s1514_s20, %s20_s20   ;;  %s1467_s19 = sphi %s1512_s19, %s1862_s19   ;;  %s1463_s18 = sphi %s1510_s18, %s1861_s18   ;;  %s1459_s17 = sphi %s1508_s17, %s1860_s17   ;;  %s1455_s16 = sphi %s1506_s16, %s1859_s16   ;;  %s1451_s15 = sphi %s1504_s15, %s1858_s15  }
   0x7   : > { %s32_s23 = sadd.s32 1, %s1467_s19  ;;  %s41_s24 = sadd.s32 1, %s1459_s17 }
   0x8   : > { %p34_p0 = scmp.ge.s32.totalorder %s32_s23, 2  ;;  %p48_p1 = scmp.ne.s32.totalorder %s1459_s17, %s1455_s16 }
   0x9   : > { %p49_p2 = scmp.eq.s32.totalorder %s1471_s20, 0  ;;  %p54_p3 = scmp.ne.s32.totalorder %s1455_s16, %s1451_s15 }
   0xa   : > { %s1864_s23 = smov (%p34_p0, %s32_s23), 0  ;;  %p55_p5 = scmp.eq.s32.totalorder %s1045_s21, 0 }
   0xb   : > { %p1545_p4 = por %p49_p2, %p48_p1  ;;  %s36_s26 = ssub.s32 %s1467_s19, %s1864_s23 }
   0xc   : > { %p146_p6 = scmp.eq.s32.totalorder %s1045_s21, 1  ;;  %p39_p7 = scmp.eq.s32.totalorder %s36_s26, 0 }
   0xd   : > { %p1551_p8 = por %p55_p5, %p54_p3  ;;  %p152_p10 = scmp.eq.s32.totalorder %s1046_s22, 1 }
   0xe   : > { %p1555_p9 = por %p146_p6, %p48_p1  ;;  %p1262_p13 = scmp.lt.s32.totalorder %s1471_s20, 2 }
   0xf   : > { %s1560_s29 = scalar_select %p39_p7, %s1459_s17, %s41_s24  }
  0x10   : > { %s1851_s28 = scalar_select %p1555_p9, 1, 0 }
  0x11   : > { %p1562_p11 = por %p152_p10, %p54_p3  ;;  %s187_s5 = sand.u32 1, %s1459_s17  }
  0x12   : > { %s1050_s6 = sshll.u32 %s187_s5, 7  ;;  %s1114_s7 = sshll.u32 %s1467_s19, 11 }
  0x13   : > { %s1852_s30 = scalar_select %p1562_p11, 1, 0 }
  0x14   : > { %s1573_s10 = scalar_lea.hbm %s1843_s0, %s1114_s7  ;;  %s191_s11 = scalar_lea.vmem [#allocation2], %s1050_s6 }
  0x15   : > { %s201_s12 = sshll.u32 %s191_s11, 4  ;;  %p1579_p0 = pnand %p1262_p13, %p1545_p4  ;;  %s1575_s12 = int_to_ptr.vmem [resolvable:$true] %s201_s12 }
  0x16   : > { %s1584_s14 = scalar_lea.sflag [#allocation3], %s187_s5  ;;  %s1359_s21 = scalar_lea.hbm %s1573_s10, 2048 }
  0x17   : > { %p1360_p2 = scmp.ne.s32.totalorder %s1573_s10, %s1359_s21  ;;  %p1361_p3 = pneg %p1579_p0 }
  0x18   : > { %s1364_s25 = scalar_lea.hbm %s1843_s0, 4096  ;;  %p1365_p4 = scmp.lt.u32.totalorder %s1573_s10, %s1843_s0 }
  0x19   : > { %p1362_p5 = pnand %p1361_p3, %p1360_p2  ;;  %p1366_p7 = scmp.lt.u32.totalorder %s1364_s25, %s1359_s21 }
  0x1a   : > { %p1368_p13 = scmp.lt.u32.totalorder %s1359_s21, %s1573_s10 }
  0x1b   : > { %p1363_p6 = pneg %p1362_p5  ;;  %p1367_p10 = por %p1366_p7, %p1365_p4 }
  0x1d   : > { %p1369_p12 = por %p1368_p13, %p1367_p10 }
  0x1f   : > { %p1370_p1 = pnand %p1369_p12, %p1363_p6 }
  0x21   : > { %1373 = shalt.err (!%p1370_p1)
}
  0x22   : > { %s1374_s5 = scalar_lea.vmem %s1575_s12, 2048  ;;  %s1473_s7 = smov [#allocation2]  }
  0x23   : > { %p1375_p2 = scmp.ne.s32.totalorder %s1575_s12, %s1374_s5  ;;  %s1379_s8 = sshll.u32 %s1473_s7, 4  ;;  %s1380_s8 = int_to_ptr.vmem [resolvable:$false] %s1379_s8 }
  0x24   : > { %s1381_s9 = scalar_lea.vmem %s1380_s8, 4096  ;;  %p1382_p9 = scmp.lt.s32.totalorder %s1575_s12, %s1380_s8 }
  0x25   : > { %p1377_p5 = pnand %p1375_p2, %p1361_p3  ;;  %p1383_p4 = scmp.lt.s32.totalorder %s1381_s9, %s1374_s5 }
  0x27   : > { %p1378_p11 = pneg %p1377_p5  ;;  %p1384_p7 = por %p1383_p4, %p1382_p9 }
  0x29   : > { %p1385_p10 = pnand %p1384_p7, %p1378_p11 }
  0x2b   : > { %1388 = shalt.err (!%p1385_p10)
}
  0x2c   : > { %s1474_s11 = smov 128   ;;  %s1475_s21 = smov 8  }
  0x2d   : > { %1257 = dma.hbm_to_vmem [thread:$0]  (!%p1579_p0), %s1573_s10, 2048, %s1575_s12, %s1584_s14, %s1474_s11, %s1474_s11, %s1475_s21  }
  0x2e   : > { %p209_p12 = scmp.lt.s32.totalorder %s1471_s20, 3  ;;  %p1854_p1 = scmp.ge.s32.totalorder %s1471_s20, 1 }
  0x30   : > { %p210_p3 = pnand %p1854_p1, %p209_p12 }
  0x31   : > { %s1616_s22 = sand.u32 (!%p210_p3), 1, %s1455_s16  }
  0x32   : > { %213 = sbr.rel (%p210_p3) target bundleno = 632 (0x278), region = 36  ;;  %s1055_s24 = sshll.u32 (!%p210_p3), %s1616_s22, 7 }
  0x33   : > { %s216_s25 = scalar_lea.sflag (!%p210_p3), [#allocation3], %s1616_s22  ;;  %s1622_s26 = scalar_lea.vmem (!%p210_p3), [#allocation2], %s1055_s24 }
  0x39   : > { %1442 = dma.done.wait (%p1551_p8), %s216_s25, 2048  }
  0x3a   : > { %1444 = vsyncadd (%p1551_p8), %s216_s25, 4294965248  ;;  %v1317_v0 = vld [vmem:[%s1845_s2] sm:$0xff]   ;;  %v1318_v1 = vld [vmem:[%s1845_s2 + $0x8] sm:$0xff]   ;;  %vm414_vm0 = vcmask 261120   ;;  %s1769_s25 = scalar_lea.vmem [#allocation5], %s1055_s24  ;;  %s1115_s24 = sshll.u32 %s1463_s18, 11 }
  0x3b   : > { %1198 = vmatprep.subr.bf16.mxu0 %v1317_v0  ;;  %v1319_v2 = vld [vmem:[%s1844_s1] sm:$0xff]   ;;  %v1320_v3 = vld [vmem:[%s1844_s1 + $0x8] sm:$0xff]   ;;  %v1321_v4 = vld [vmem:[%s1844_s1 + $0x10] sm:$0xff]   ;;  %s1790_s13 = scalar_lea.hbm %s1847_s4, %s1115_s24  ;;  %s933_s14 = scalar_lea.sflag [#allocation4], %s1616_s22 }
  0x3c   : > { %1199 = vmatpush3.bf16.msra.mxu0 %v1317_v0  ;;  %1202 = vmatprep.mubr.msk.bf16.mxu0 %vm414_vm0, %v1319_v2  ;;  %v1322_v5 = vld [vmem:[%s1844_s1 + $0x18] sm:$0xff]   ;;  %v1323_v6 = vld [vmem:[%s1844_s1 + $0x20] sm:$0xff]   ;;  %v1324_v7 = vld [vmem:[%s1844_s1 + $0x28] sm:$0xff]   ;;  %p1855_p9 = scmp.ne.s32.totalorder %s1851_s28, 0  ;;  %s1476_s18 = smov [#allocation5]  }
  0x3d   : > { %1200 = vmatprep.subr.bf16.mxu0 %v1318_v1  ;;  %v1325_v8 = vld [vmem:[%s1844_s1 + $0x30] sm:$0xff]   ;;  %v1326_v9 = vld [vmem:[%s1844_s1 + $0x38] sm:$0xff]   ;;  %v1327_v10 = vld [vmem:[%s1844_s1 + $0x40] sm:$0xff]   ;;  %s1393_s5 = sshll.u32 %s1476_s18, 4  ;;  %s1394_s5 = int_to_ptr.vmem [resolvable:$false] %s1393_s5 }
  0x3e   : > { %v1328_v11 = vld [vmem:[%s1844_s1 + $0x48] sm:$0xff]   ;;  %v1329_v12 = vld [vmem:[%s1844_s1 + $0x50] sm:$0xff]   ;;  %v1330_v13 = vld [vmem:[%s1844_s1 + $0x58] sm:$0xff]   ;;  %s1395_s27 = scalar_lea.vmem %s1394_s5, 4096 }
  0x3f   : > { %v1331_v14 = vld [vmem:[%s1844_s1 + $0x60] sm:$0xff]   ;;  %v1332_v15 = vld [vmem:[%s1844_s1 + $0x68] sm:$0xff]   ;;  %v1333_v16 = vld [vmem:[%s1844_s1 + $0x70] sm:$0xff]  }
  0x40   : > { %1201 = vmatpush3.bf16.msra.mxu0 %v1318_v1  ;;  %v1334_v17 = vld [vmem:[%s1844_s1 + $0x78] sm:$0xff]   ;;  %v1355_v19 = vld [vmem:[%s1622_s26 + $0x4] ss:$8 sps:$4 sm:$0xff]   ;;  %v1703_v21 = vld [vmem:[%s1846_s3] ss:$0 sm:$0xff] }
  0x41   : > { %v1337_v18 = vld [vmem:[%s1622_s26 + $0x14] ss:$8 sps:$4 sm:$0xff]  }
  0x42   : > { %792 = vmatprep.mubr.bf16.mxu1 %v1337_v18 }
  0x43   : > { %1203 = vmatmul.mubr.msk.bf16.vlgmr.msra.gmra.mrb[0].mxu0 %vm414_vm0, %v1320_v3 }
  0x44   : > { %1206 = vmatprep.mubr.msk.bf16.mxu0 %vm414_vm0, %v1321_v4 }
  0x4b   : > { %1207 = vmatmul.mubr.msk.bf16.gmra.mrb[4].mxu0 %vm414_vm0, %v1322_v5 }
  0x4c   : > { %1210 = vmatprep.mubr.msk.bf16.mxu0 %vm414_vm0, %v1323_v6 }
  0x53   : > { %1211 = vmatmul.mubr.msk.bf16.gmra.mrb[8].mxu0 %vm414_vm0, %v1324_v7 }
  0x54   : > { %1214 = vmatprep.mubr.msk.bf16.mxu0 %vm414_vm0, %v1325_v8 }
  0x5b   : > { %1215 = vmatmul.mubr.msk.bf16.gmra.mrb[12].mxu0 %vm414_vm0, %v1326_v9 }
  0x5c   : > { %1218 = vmatprep.mubr.msk.bf16.mxu0 %vm414_vm0, %v1327_v10 }
  0x63   : > { %1219 = vmatmul.mubr.msk.bf16.gmra.mrb[16].mxu0 %vm414_vm0, %v1328_v11 }
  0x64   : > { %1222 = vmatprep.mubr.msk.bf16.mxu0 %vm414_vm0, %v1329_v12 }
  0x6b   : > { %1223 = vmatmul.mubr.msk.bf16.gmra.mrb[20].mxu0 %vm414_vm0, %v1330_v13 }
  0x6c   : > { %1226 = vmatprep.mubr.msk.bf16.mxu0 %vm414_vm0, %v1331_v14 }
  0x73   : > { %1227 = vmatmul.mubr.msk.bf16.gmra.mrb[24].mxu0 %vm414_vm0, %v1332_v15 }
  0x74   : > { %1230 = vmatprep.mubr.msk.bf16.mxu0 %vm414_vm0, %v1333_v16 }
  0x7b   : > { %1231 = vmatmul.mubr.msk.bf16.gmra.mrb[28].mxu0 %vm414_vm0, %v1334_v17 }
  0x7c   : > { %784 = vmatprep.mubr.bf16.mxu0 %v1355_v19 }
 0x116   : > { %v1204_v20 = vpop.f32.mrb[0].mxu0 }
 0x117   : > { %v497_v22 = vpop.f32.mrb[1].mxu0  ;;  %v506_v24 = vadd.f32 %v1204_v20, %v1703_v21 }
 0x118   : > { %v1205_v23 = vpop.f32.mrb[2].mxu0  ;;  %v498_v27 = vadd.f32 %v1703_v21, %v497_v22 }
 0x119   : > { %v509_v25 = vadd.f32 %v1205_v23, %v1703_v21  ;;  %v500_v26 = vpop.f32.mrb[3].mxu0 }
 0x11a   : > { %v501_v28 = vadd.f32 %v1703_v21, %v500_v26 }
 0x11b   : > { %v625_v29 = vpack.c.bf16 %v509_v25, %v506_v24 }
 0x11c   : > { %v624_v30 = vpack.c.bf16 %v501_v28, %v498_v27 }
 0x11e   : > { %v1208_v31 = vpop.f32.mrb[4].mxu0 }
 0x11f   : > { %v513_v32 = vpop.f32.mrb[5].mxu0  ;;  %v522_v34 = vadd.f32 %v1208_v31, %v1703_v21 }
 0x120   : > { %v1209_v33 = vpop.f32.mrb[6].mxu0  ;;  %v514_v37 = vadd.f32 %v1703_v21, %v513_v32 }
 0x121   : > { %v525_v35 = vadd.f32 %v1209_v33, %v1703_v21  ;;  %v516_v36 = vpop.f32.mrb[7].mxu0 }
 0x122   : > { %v517_v38 = vadd.f32 %v1703_v21, %v516_v36 }
 0x123   : > { %v1713_v39 = vpack.c.bf16 %v525_v35, %v522_v34 }
 0x124   : > { %v626_v40 = vpack.c.bf16 %v517_v38, %v514_v37  ;;  %v1335_v38 = vld [vmem:[%s1622_s26 + $0x10] ss:$8 sps:$4 sm:$0xff]  }
 0x126   : > { %v1212_v41 = vpop.f32.mrb[8].mxu0 }
 0x127   : > { %v529_v42 = vpop.f32.mrb[9].mxu0  ;;  %v538_v44 = vadd.f32 %v1212_v41, %v1703_v21  ;;  %v1341_v41 = vld [vmem:[%s1622_s26 + $0x34] ss:$8 sps:$4 sm:$0xff]  }
 0x128   : > { %v1213_v43 = vpop.f32.mrb[10].mxu0  ;;  %v530_v47 = vadd.f32 %v1703_v21, %v529_v42  ;;  %v1343_v42 = vld [vmem:[%s1622_s26 + $0x30] ss:$8 sps:$4 sm:$0xff]  }
 0x129   : > { %v541_v45 = vadd.f32 %v1213_v43, %v1703_v21  ;;  %v532_v46 = vpop.f32.mrb[11].mxu0  ;;  %v1344_v43 = vld [vmem:[%s1622_s26 + $0x44] ss:$8 sps:$4 sm:$0xff]  }
 0x12a   : > { %v533_v48 = vadd.f32 %v1703_v21, %v532_v46  ;;  %v1349_v46 = vld [vmem:[%s1622_s26 + $0x50] ss:$8 sps:$4 sm:$0xff]  }
 0x12b   : > { %v1719_v49 = vpack.c.bf16 %v541_v45, %v538_v44  ;;  %v1346_v44 = vld [vmem:[%s1622_s26 + $0x40] ss:$8 sps:$4 sm:$0xff]   ;;  %v1347_v45 = vld [vmem:[%s1622_s26 + $0x54] ss:$8 sps:$4 sm:$0xff]  }
 0x12c   : > { %v628_v50 = vpack.c.bf16 %v533_v48, %v530_v47  ;;  %v1350_v47 = vld [vmem:[%s1622_s26 + $0x64] ss:$8 sps:$4 sm:$0xff]   ;;  %v1352_v48 = vld [vmem:[%s1622_s26 + $0x60] ss:$8 sps:$4 sm:$0xff]  }
 0x12e   : > { %v1216_v51 = vpop.f32.mrb[12].mxu0 }
 0x12f   : > { %v545_v52 = vpop.f32.mrb[13].mxu0  ;;  %v554_v54 = vadd.f32 %v1216_v51, %v1703_v21 }
 0x130   : > { %v1217_v53 = vpop.f32.mrb[14].mxu0  ;;  %v546_v57 = vadd.f32 %v1703_v21, %v545_v52 }
 0x131   : > { %v557_v55 = vadd.f32 %v1217_v53, %v1703_v21  ;;  %v548_v56 = vpop.f32.mrb[15].mxu0 }
 0x132   : > { %v549_v58 = vadd.f32 %v1703_v21, %v548_v56 }
 0x133   : > { %v1725_v59 = vpack.c.bf16 %v557_v55, %v554_v54 }
 0x134   : > { %v1727_v60 = vpack.c.bf16 %v549_v58, %v546_v57 }
 0x136   : > { %v1220_v61 = vpop.f32.mrb[16].mxu0 }
 0x137   : > { %v561_v62 = vpop.f32.mrb[17].mxu0  ;;  %v570_v0 = vadd.f32 %v1220_v61, %v1703_v21 }
 0x138   : > { %v1221_v63 = vpop.f32.mrb[18].mxu0  ;;  %v562_v3 = vadd.f32 %v1703_v21, %v561_v62 }
 0x139   : > { %v573_v1 = vadd.f32 %v1221_v63, %v1703_v21  ;;  %v564_v2 = vpop.f32.mrb[19].mxu0 }
 0x13a   : > { %v565_v4 = vadd.f32 %v1703_v21, %v564_v2 }
 0x13b   : > { %v633_v5 = vpack.c.bf16 %v573_v1, %v570_v0 }
 0x13c   : > { %v632_v6 = vpack.c.bf16 %v565_v4, %v562_v3 }
 0x13e   : > { %v1224_v7 = vpop.f32.mrb[20].mxu0  ;;  %1134 = vmatprep.subr.bf16.mxu0 %v632_v6  ;;  %1234 = vmatprep.subr.bf16.mxu1 %v632_v6 }
 0x13f   : > { %v577_v8 = vpop.f32.mrb[21].mxu0  ;;  %1135 = vmatpush3.bf16.msra.mxu0 %v624_v30  ;;  %1242 = vmatpush3.bf16.msra.mxu1 %v624_v30  ;;  %v586_v10 = vadd.f32 %v1224_v7, %v1703_v21 }
 0x140   : > { %v1225_v9 = vpop.f32.mrb[22].mxu0  ;;  %1136 = vmatprep.subr.bf16.mxu0 %v633_v5  ;;  %1235 = vmatprep.subr.bf16.mxu1 %v633_v5  ;;  %v578_v13 = vadd.f32 %v1703_v21, %v577_v8 }
 0x141   : > { %v589_v11 = vadd.f32 %v1225_v9, %v1703_v21  ;;  %v580_v12 = vpop.f32.mrb[23].mxu0 }
 0x142   : > { %v581_v14 = vadd.f32 %v1703_v21, %v580_v12 }
 0x143   : > { %v635_v15 = vpack.c.bf16 %v589_v11, %v586_v10  ;;  %1137 = vmatpush3.bf16.msra.mxu0 %v625_v29  ;;  %1243 = vmatpush3.bf16.msra.mxu1 %v625_v29 }
 0x144   : > { %v634_v16 = vpack.c.bf16 %v581_v14, %v578_v13 }
 0x146   : > { %v1228_v17 = vpop.f32.mrb[24].mxu0  ;;  %1138 = vmatprep.subr.bf16.mxu0 %v634_v16  ;;  %1236 = vmatprep.subr.bf16.mxu1 %v634_v16 }
 0x147   : > { %v593_v18 = vpop.f32.mrb[25].mxu0  ;;  %1139 = vmatpush3.bf16.msra.mxu0 %v626_v40  ;;  %1244 = vmatpush3.bf16.msra.mxu1 %v626_v40  ;;  %v602_v20 = vadd.f32 %v1228_v17, %v1703_v21  ;;  %v1340_v40 = vld [vmem:[%s1622_s26 + $0x20] ss:$8 sps:$4 sm:$0xff]  }
 0x148   : > { %v1229_v19 = vpop.f32.mrb[26].mxu0  ;;  %1140 = vmatprep.subr.bf16.mxu0 %v635_v15  ;;  %1237 = vmatprep.subr.bf16.mxu1 %v635_v15  ;;  %v594_v24 = vadd.f32 %v1703_v21, %v593_v18 }
 0x149   : > { %v605_v22 = vadd.f32 %v1229_v19, %v1703_v21  ;;  %v596_v23 = vpop.f32.mrb[27].mxu0 }
 0x14a   : > { %v597_v25 = vadd.f32 %v1703_v21, %v596_v23 }
 0x14b   : > { %v637_v26 = vpack.c.bf16 %v605_v22, %v602_v20  ;;  %1141 = vmatpush3.bf16.msra.mxu0 %v1713_v39  ;;  %1245 = vmatpush3.bf16.msra.mxu1 %v1713_v39  ;;  %v1338_v39 = vld [vmem:[%s1622_s26 + $0x24] ss:$8 sps:$4 sm:$0xff]  }
 0x14c   : > { %v636_v27 = vpack.c.bf16 %v597_v25, %v594_v24 }
 0x14e   : > { %v1232_v28 = vpop.f32.mrb[28].mxu0  ;;  %1142 = vmatprep.subr.bf16.mxu0 %v636_v27  ;;  %1238 = vmatprep.subr.bf16.mxu1 %v636_v27 }
 0x14f   : > { %v609_v29 = vpop.f32.mrb[29].mxu0  ;;  %1143 = vmatpush3.bf16.msra.mxu0 %v628_v50  ;;  %1246 = vmatpush3.bf16.msra.mxu1 %v628_v50  ;;  %v618_v31 = vadd.f32 %v1232_v28, %v1703_v21  ;;  %v1358_v50 = vld [vmem:[%s1622_s26 + $0x70] ss:$8 sps:$4 sm:$0xff]  }
 0x150   : > { %v1233_v30 = vpop.f32.mrb[30].mxu0  ;;  %1144 = vmatprep.subr.bf16.mxu0 %v637_v26  ;;  %1239 = vmatprep.subr.bf16.mxu1 %v637_v26  ;;  %v610_v34 = vadd.f32 %v1703_v21, %v609_v29 }
 0x151   : > { %v621_v32 = vadd.f32 %v1233_v30, %v1703_v21  ;;  %v612_v33 = vpop.f32.mrb[31].mxu0 }
 0x152   : > { %v613_v35 = vadd.f32 %v1703_v21, %v612_v33  ;;  %v1353_v21 = vld [vmem:[%s1622_s26] ss:$8 sps:$4 sm:$0xff]  }
 0x153   : > { %v639_v36 = vpack.c.bf16 %v621_v32, %v618_v31  ;;  %1145 = vmatpush3.bf16.msra.mxu0 %v1719_v49  ;;  %1247 = vmatpush3.bf16.msra.mxu1 %v1719_v49  ;;  %v1356_v49 = vld [vmem:[%s1622_s26 + $0x74] ss:$8 sps:$4 sm:$0xff]   ;;  %s946_s26 = sshll.u32 %s1769_s25, 4  ;;  %s1792_s26 = int_to_ptr.vmem [resolvable:$true] %s946_s26 }
 0x154   : > { %v638_v37 = vpack.c.bf16 %v613_v35, %v610_v34  ;;  %s1389_s6 = scalar_lea.vmem %s1792_s26, 2048  ;;  %p1396_p6 = scmp.lt.s32.totalorder %s1792_s26, %s1394_s5 }
 0x155   : > { %p1390_p8 = scmp.ne.s32.totalorder %s1792_s26, %s1389_s6  ;;  %p1397_p13 = scmp.lt.s32.totalorder %s1395_s27, %s1389_s6 }
 0x156   : > { %1146 = vmatprep.subr.bf16.mxu0 %v638_v37  ;;  %1240 = vmatprep.subr.bf16.mxu1 %v638_v37 }
 0x157   : > { %1147 = vmatpush3.bf16.msra.mxu0 %v1727_v60  ;;  %1248 = vmatpush3.bf16.msra.mxu1 %v1727_v60  ;;  %p1391_p11 = pnand %p1390_p8, %p1855_p9  ;;  %p1398_p2 = por %p1397_p13, %p1396_p6 }
 0x158   : > { %1148 = vmatprep.subr.bf16.mxu0 %v639_v36  ;;  %1241 = vmatprep.subr.bf16.mxu1 %v639_v36 }
 0x159   : > { %p1392_p0 = pneg %p1391_p11 }
 0x15b   : > { %1149 = vmatpush3.bf16.msra.mxu0 %v1725_v59  ;;  %1249 = vmatpush3.bf16.msra.mxu1 %v1725_v59  ;;  %p1399_p5 = pnand %p1398_p2, %p1392_p0 }
 0x15e   : > { %793 = vmatmul.mubr.bf16.vlgmr.msra.gmra.mrb[0].mxu1 %v1335_v38  ;;  %785 = vmatmul.mubr.bf16.vlgmr.msra.gmra.mrb[32].mxu0 %v1353_v21 }
 0x15f   : > { %800 = vmatprep.mubr.bf16.mxu1 %v1338_v39 }
 0x166   : > { %801 = vmatmul.mubr.bf16.gmra.mrb[4].mxu1 %v1340_v40 }
 0x167   : > { %808 = vmatprep.mubr.bf16.mxu1 %v1341_v41 }
 0x16e   : > { %809 = vmatmul.mubr.bf16.gmra.mrb[8].mxu1 %v1343_v42 }
 0x16f   : > { %816 = vmatprep.mubr.bf16.mxu1 %v1344_v43 }
 0x176   : > { %817 = vmatmul.mubr.bf16.gmra.mrb[12].mxu1 %v1346_v44 }
 0x177   : > { %824 = vmatprep.mubr.bf16.mxu1 %v1347_v45 }
 0x17e   : > { %825 = vmatmul.mubr.bf16.gmra.mrb[16].mxu1 %v1349_v46 }
 0x17f   : > { %832 = vmatprep.mubr.bf16.mxu1 %v1350_v47 }
 0x186   : > { %833 = vmatmul.mubr.bf16.gmra.mrb[20].mxu1 %v1352_v48 }
 0x187   : > { %840 = vmatprep.mubr.bf16.mxu1 %v1356_v49 }
 0x18e   : > { %841 = vmatmul.mubr.bf16.gmra.mrb[24].mxu1 %v1358_v50 }
 0x231   : > { %v1156_v51 = vpop.f32.mrb[0].mxu1  ;;  %v1150_v52 = vpop.f32.mrb[32].mxu0 }
 0x232   : > { %v1157_v53 = vpop.f32.mrb[1].mxu1  ;;  %v1151_v54 = vpop.f32.mrb[33].mxu0 }
 0x233   : > { %v1158_v55 = vadd.f32 %v1157_v53, %v1156_v51  ;;  %v1159_v56 = vpop.f32.mrb[2].mxu1  ;;  %v1152_v57 = vadd.f32 %v1151_v54, %v1150_v52  ;;  %v1153_v58 = vpop.f32.mrb[34].mxu0 }
 0x234   : > { %v1160_v59 = vpop.f32.mrb[3].mxu1  ;;  %v1154_v60 = vpop.f32.mrb[35].mxu0 }
 0x235   : > { %v1161_v61 = vadd.f32 %v1160_v59, %v1159_v56  ;;  %v1155_v62 = vadd.f32 %v1154_v60, %v1153_v58  ;;  %v902_v63 = vmax.f32 %v1158_v55, 0.0  ;;  %v900_v0 = vmax.f32 %v1152_v57, 0.0 }
 0x237   : > { %918 = vst [vmem:[%s1769_s25 + $0x10] sm:$0xff] %v902_v63  ;;  %v903_v1 = vmax.f32 %v1161_v61, 0.0  ;;  %916 = vst [vmem:[%s1769_s25] sm:$0xff] %v900_v0  ;;  %v901_v3 = vmax.f32 %v1155_v62, 0.0 }
 0x239   : > { %v1162_v2 = vpop.f32.mrb[4].mxu1  ;;  %919 = vst [vmem:[%s1769_s25 + $0x18] sm:$0xff] %v903_v1  ;;  %917 = vst [vmem:[%s1769_s25 + $0x8] sm:$0xff] %v901_v3 }
 0x23a   : > { %v1163_v4 = vpop.f32.mrb[5].mxu1 }
 0x23b   : > { %v1164_v5 = vadd.f32 %v1163_v4, %v1162_v2  ;;  %v1165_v6 = vpop.f32.mrb[6].mxu1 }
 0x23c   : > { %v1166_v7 = vpop.f32.mrb[7].mxu1 }
 0x23d   : > { %v1167_v8 = vadd.f32 %v1166_v7, %v1165_v6  ;;  %v904_v9 = vmax.f32 %v1164_v5, 0.0 }
 0x23f   : > { %920 = vst [vmem:[%s1769_s25 + $0x20] sm:$0xff] %v904_v9  ;;  %v905_v10 = vmax.f32 %v1167_v8, 0.0 }
 0x241   : > { %v1168_v11 = vpop.f32.mrb[8].mxu1  ;;  %921 = vst [vmem:[%s1769_s25 + $0x28] sm:$0xff] %v905_v10 }
 0x242   : > { %v1169_v12 = vpop.f32.mrb[9].mxu1 }
 0x243   : > { %v1170_v13 = vadd.f32 %v1169_v12, %v1168_v11  ;;  %v1171_v14 = vpop.f32.mrb[10].mxu1 }
 0x244   : > { %v1172_v15 = vpop.f32.mrb[11].mxu1 }
 0x245   : > { %v1173_v16 = vadd.f32 %v1172_v15, %v1171_v14  ;;  %v906_v17 = vmax.f32 %v1170_v13, 0.0 }
 0x247   : > { %922 = vst [vmem:[%s1769_s25 + $0x30] sm:$0xff] %v906_v17  ;;  %v907_v18 = vmax.f32 %v1173_v16, 0.0 }
 0x249   : > { %v1174_v19 = vpop.f32.mrb[12].mxu1  ;;  %923 = vst [vmem:[%s1769_s25 + $0x38] sm:$0xff] %v907_v18 }
 0x24a   : > { %v1175_v20 = vpop.f32.mrb[13].mxu1 }
 0x24b   : > { %v1176_v22 = vadd.f32 %v1175_v20, %v1174_v19  ;;  %v1177_v23 = vpop.f32.mrb[14].mxu1 }
 0x24c   : > { %v1178_v24 = vpop.f32.mrb[15].mxu1 }
 0x24d   : > { %v1179_v25 = vadd.f32 %v1178_v24, %v1177_v23  ;;  %v908_v26 = vmax.f32 %v1176_v22, 0.0 }
 0x24f   : > { %924 = vst [vmem:[%s1769_s25 + $0x40] sm:$0xff] %v908_v26  ;;  %v909_v27 = vmax.f32 %v1179_v25, 0.0 }
 0x251   : > { %v1180_v28 = vpop.f32.mrb[16].mxu1  ;;  %925 = vst [vmem:[%s1769_s25 + $0x48] sm:$0xff] %v909_v27 }
 0x252   : > { %v1181_v29 = vpop.f32.mrb[17].mxu1 }
 0x253   : > { %v1182_v30 = vadd.f32 %v1181_v29, %v1180_v28  ;;  %v1183_v31 = vpop.f32.mrb[18].mxu1 }
 0x254   : > { %v1184_v32 = vpop.f32.mrb[19].mxu1 }
 0x255   : > { %v1185_v33 = vadd.f32 %v1184_v32, %v1183_v31  ;;  %v910_v34 = vmax.f32 %v1182_v30, 0.0 }
 0x257   : > { %926 = vst [vmem:[%s1769_s25 + $0x50] sm:$0xff] %v910_v34  ;;  %v911_v35 = vmax.f32 %v1185_v33, 0.0 }
 0x259   : > { %v1186_v36 = vpop.f32.mrb[20].mxu1  ;;  %927 = vst [vmem:[%s1769_s25 + $0x58] sm:$0xff] %v911_v35 }
 0x25a   : > { %v1187_v37 = vpop.f32.mrb[21].mxu1 }
 0x25b   : > { %v1188_v38 = vadd.f32 %v1187_v37, %v1186_v36  ;;  %v1189_v21 = vpop.f32.mrb[22].mxu1 }
 0x25c   : > { %v1190_v39 = vpop.f32.mrb[23].mxu1 }
 0x25d   : > { %v1191_v40 = vadd.f32 %v1190_v39, %v1189_v21  ;;  %v912_v41 = vmax.f32 %v1188_v38, 0.0 }
 0x25f   : > { %928 = vst [vmem:[%s1769_s25 + $0x60] sm:$0xff] %v912_v41  ;;  %v913_v42 = vmax.f32 %v1191_v40, 0.0 }
 0x261   : > { %v1192_v43 = vpop.f32.mrb[24].mxu1  ;;  %929 = vst [vmem:[%s1769_s25 + $0x68] sm:$0xff] %v913_v42 }
 0x262   : > { %v1193_v44 = vpop.f32.mrb[25].mxu1 }
 0x263   : > { %v1194_v45 = vadd.f32 %v1193_v44, %v1192_v43  ;;  %v1195_v46 = vpop.f32.mrb[26].mxu1 }
 0x264   : > { %v1196_v47 = vpop.f32.mrb[27].mxu1 }
 0x265   : > { %v1197_v48 = vadd.f32 %v1196_v47, %v1195_v46  ;;  %v914_v49 = vmax.f32 %v1194_v45, 0.0 }
 0x267   : > { %930 = vst [vmem:[%s1769_s25 + $0x70] sm:$0xff] %v914_v49  ;;  %v915_v50 = vmax.f32 %v1197_v48, 0.0 }
 0x269   : > { %931 = vst [vmem:[%s1769_s25 + $0x78] sm:$0xff] %v915_v50 }
 0x26a   : > { %1402 = shalt.err (!%p1399_p5)
}
 0x26b   : > { %s1403_s7 = scalar_lea.hbm %s1790_s13, 2048  ;;  %s1407_s11 = scalar_lea.hbm %s1847_s4, 4096 }
 0x26c   : > { %p1404_p4 = scmp.ne.s32.totalorder %s1790_s13, %s1403_s7  ;;  %p1408_p12 = scmp.lt.u32.totalorder %s1790_s13, %s1847_s4 }
 0x26d   : > { %p1409_p1 = scmp.lt.u32.totalorder %s1407_s11, %s1403_s7  ;;  %p1411_p8 = scmp.lt.u32.totalorder %s1403_s7, %s1790_s13 }
 0x26e   : > { %p1405_p7 = pnand %p1404_p4, %p1855_p9 }
 0x26f   : > { %p1410_p3 = por %p1409_p1, %p1408_p12 }
 0x270   : > { %p1406_p10 = pneg %p1405_p7 }
 0x271   : > { %p1412_p11 = por %p1411_p8, %p1410_p3 }
 0x273   : > { %p1413_p0 = pnand %p1412_p11, %p1406_p10 }
 0x275   : > { %1416 = shalt.err (!%p1413_p0)
}
 0x276   : > { %s1477_s24 = smov 128   ;;  %s1478_s10 = smov 8  }
 0x277   : > { %1252 = dma.vmem_to_hbm [thread:$0]  (%p1855_p9), %s1792_s26, 2048, %s1790_s13, %s933_s14, %s1477_s24, %s1477_s24, %s1478_s10  }
 0x278 PF: > { %s961_s12 = sand.u32 1, %s1451_s15   ;;  %p1856_p6 = scmp.ne.s32.totalorder %s1852_s30, 0 }
 0x279   : > { %p1857_p13 = scmp.ge.s32.totalorder %s1471_s20, 2  ;;  %s962_s6 = scalar_lea.sflag [#allocation4], %s961_s12 }
 0x27b   : > { %p1259_p2 = pnand %p1857_p13, %p1856_p6 }
 0x27d   : > { %1446 = dma.done.wait (!%p1259_p2), %s962_s6, 2048  }
 0x27e   : > { %1448 = vsyncadd (!%p1259_p2), %s962_s6, 4294965248  ;;  %s20_s20 = sadd.s32 1, %s1471_s20   ;;  %s1858_s15 = smov %s1455_s16 }
 0x27f   : > { %p17_p5 = scmp.ge.s32.totalorder %s20_s20, 4   ;;  %s1859_s16 = smov %s1459_s17 }
 0x280   : > { %s1860_s17 = smov %s1560_s29  ;;  %s1861_s18 = smov %s1467_s19 }
 0x281   : > { %s1862_s19 = smov %s1864_s23  ;;  %19 = sbr.rel (!%p17_p5) target bundleno = 6 (0x6), region = 92 }
 0x288   :  { %967 = vsyncpa [#allocation3], 1 }
 0x289   :  { %969 = vsyncpa [#allocation3 + $0x1], 1 }
 0x28a   :  { %970 = vsyncpa [#allocation4], 1 }
 0x28b   :  { %972 = vsyncpa [#allocation4 + $0x1], 1 }

</bundles_post_ra>
